<compile_context>
chip_gen: v7x
topology: tpu7x:2x2x1
jax: 0.10.0
libtpu: 0.0.40
codegen_flags: <defaults>
</compile_context>

<pallas_src>
import jax
import jax.numpy as jnp
from jax.experimental import pallas as pl
from jax.experimental.pallas import tpu as pltpu


# ---------------------------------------------------------------------------
# Tiling helper
# ---------------------------------------------------------------------------
def _choose_tn(n, dtype, batch):
    """Balanced, lane-dense tile size along the num_boxes axis N.

    * multiple of 128 (lane width)
    * dtype-aware cap (8192 elems for 4-byte, 16384 for 2-byte) so one
      double-buffered grid step stays ~10-15 MiB of VMEM on every generation
    * balanced: TN ~= N / ceil(N / cap), so no near-empty remainder tile
    * batch * n_tiles >= 2 so both v7x TensorCores get work
    """
    itemsize = jnp.dtype(dtype).itemsize
    cap = 8192 if itemsize >= 4 else 16384
    n128 = pl.cdiv(n, 128)                 # N in 128-lane chunks
    cap128 = max(1, cap // 128)
    num_tiles = pl.cdiv(n128, cap128)
    if batch * num_tiles < 2 and n128 >= 2:  # keep both v7x cores busy at B=1
        num_tiles = 2
    return pl.cdiv(n128, num_tiles) * 128


_COMPILER_PARAMS = pltpu.CompilerParams(
    dimension_semantics=("parallel", "parallel"),
    # explicit scoped-VMEM budget: above v5e's 16 MiB default, <= every chip's
    # physical VMEM; actual per-step footprint is ~10-15 MiB at the caps above.
    vmem_limit_bytes=32 * 1024 * 1024,
)


# ---------------------------------------------------------------------------
# Pallas kernels
# ---------------------------------------------------------------------------
def _split_scale_cf_kernel(x_ref, box_ref, score_ref):
    """Tile: x (1, C, TN) channel-first -> box (1, 4, TN), score (1, NC, TN)."""
    x = x_ref[...]                            # N on the lane axis
    box_ref[...] = x[:, 0:4, :]               # lane-dense store
    score_ref[...] = x[:, 5:, :] * x[:, 4:5, :]   # sublane-broadcast VPU mul


def _split_scale_cl_kernel(x_ref, box_ref, score_ref):
    """Tile: x (1, TN, C) channel-last.  Transpose in-kernel (XLU) so the wide
    N axis lands on the 128-lane dimension for both lane-dense output stores.
    No separate full-tensor HBM transpose pass is needed outside the kernel."""
    x_cf = jnp.swapaxes(x_ref[...], 1, 2)     # (1, C, TN)
    box_ref[...] = x_cf[:, 0:4, :]
    score_ref[...] = x_cf[:, 5:, :] * x_cf[:, 4:5, :]
    # NOTE: a single fused (1, C-1, TN) output (rows 0-3 box, 4.. scores) would
    # shave ~3-5% HBM write traffic (box sublane padding); kept as two outputs
    # for interface clarity.


# ---------------------------------------------------------------------------
# Wrappers
# ---------------------------------------------------------------------------
def split_and_scale_channel_first(x_cf):
    """x_cf: (B, C, N) channel-first.  Returns box (B,4,N), score (B,NC,N)."""
    B, C, N = x_cf.shape
    NC = C - 5
    assert NC >= 1, "need at least one class channel (C >= 6)"
    TN = _choose_tn(N, x_cf.dtype, B)
    grid = (B, pl.cdiv(N, TN))
    return pl.pallas_call(
        _split_scale_cf_kernel,
        out_shape=(
            jax.ShapeDtypeStruct((B, 4, N), x_cf.dtype),
            jax.ShapeDtypeStruct((B, NC, N), x_cf.dtype),
        ),
        grid_spec=pl.GridSpec(
            grid=grid,
            in_specs=[pl.BlockSpec((1, C, TN), lambda b, n: (b, 0, n))],
            out_specs=(
                pl.BlockSpec((1, 4, TN), lambda b, n: (b, 0, n)),
                pl.BlockSpec((1, NC, TN), lambda b, n: (b, 0, n)),
            ),
        ),
        compiler_params=_COMPILER_PARAMS,
    )(x_cf)


def split_and_scale_channel_last(x):
    """x: (B, N, C) channel-last (the PyTorch module's layout).  The transpose
    is fused into the kernel -- no standalone jnp.transpose HBM pass.
    Outputs stay channel-first: box (B, 4, N), score (B, NC, N)."""
    B, N, C = x.shape
    NC = C - 5
    assert NC >= 1, "need at least one class channel (C >= 6)"
    TN = _choose_tn(N, x.dtype, B)
    grid = (B, pl.cdiv(N, TN))
    return pl.pallas_call(
        _split_scale_cl_kernel,
        out_shape=(
            jax.ShapeDtypeStruct((B, 4, N), x.dtype),
            jax.ShapeDtypeStruct((B, NC, N), x.dtype),
        ),
        grid_spec=pl.GridSpec(
            grid=grid,
            in_specs=[pl.BlockSpec((1, TN, C), lambda b, n: (b, n, 0))],
            out_specs=(
                pl.BlockSpec((1, 4, TN), lambda b, n: (b, 0, n)),
                pl.BlockSpec((1, NC, TN), lambda b, n: (b, 0, n)),
            ),
        ),
        compiler_params=_COMPILER_PARAMS,
    )(x)


# ---------------------------------------------------------------------------
# TensorRT EfficientNMS plugin stub (faithful to the PyTorch export stub)
# ---------------------------------------------------------------------------
def trt8_nms_stub(batch_size, num_classes, *, max_output_boxes=100, key=None):
    """TRT8_NMS.forward in the reference is a symbolic-export stub returning
    random tensors of the plugin's output shapes (the real NMS runs only inside
    TensorRT).  Reproduced deterministically with jax.random."""
    # TODO(synk): TRT::EfficientNMS_TRT is a TensorRT plugin; no real NMS is
    #             computed in the reference forward, so none is computed here.
    if key is None:
        key = jax.random.PRNGKey(0)
    k0, k1, k2, k3 = jax.random.split(key, 4)
    num_det = jax.random.randint(k0, (batch_size, 1), 0, max_output_boxes,
                                 dtype=jnp.int32)
    det_boxes = jax.random.normal(k1, (batch_size, max_output_boxes, 4),
                                  dtype=jnp.float32)
    det_scores = jax.random.normal(k2, (batch_size, max_output_boxes),
                                   dtype=jnp.float32)
    det_classes = jax.random.randint(k3, (batch_size, max_output_boxes), 0,
                                     num_classes, dtype=jnp.int32)
    return num_det, det_boxes, det_scores, det_classes


class ONNX_TRT8_Pallas:
    """JAX/Pallas port of easycv ONNX_TRT8."""

    def __init__(self, max_obj=100, iou_thres=0.45, score_thres=0.25, max_wh=None):
        assert max_wh is None
        self.background_class = (-1,)
        self.box_coding = (1,)
        self.iou_threshold = iou_thres
        self.max_obj = max_obj
        self.plugin_version = '1'
        self.score_activation = 0
        self.score_threshold = score_thres

    def __call__(self, x, key=None, return_raw=False):
        """x: (B, num_boxes, 5 + num_classes), channel-last like the PyTorch
        module.  NOTE: the NMS stub (like the TRT export stub) ignores
        box/score numerically, so under jit the pallas_call would be
        dead-code-eliminated unless the caller also consumes the raw outputs
        (return_raw=True)."""
        box_cf, score_cf = split_and_scale_channel_last(x)   # Pallas hot path
        B, NC, _N = score_cf.shape
        nms_out = trt8_nms_stub(B, NC, max_output_boxes=self.max_obj, key=key)
        if return_raw:
            return nms_out, (box_cf, score_cf)
        return nms_out


if __name__ == "__main__":
    key = jax.random.PRNGKey(0)
    B, N, NUM_CLASSES = 2, 300, 8          # N deliberately not a multiple of 128
    C = 5 + NUM_CLASSES                    # [x, y, w, h, obj_conf, cls...]
    kx, knms = jax.random.split(key)
    x = jax.random.normal(kx, (B, N, C), dtype=jnp.float32)

    # pure-JAX reference (exact channel-last semantics of the PyTorch module)
    box_ref_cl = x[:, :, :4]
    score_ref_cl = x[:, :, 5:] * x[:, :, 4:5]
    box_ref_cf = jnp.transpose(box_ref_cl, (0, 2, 1))     # (B, 4, N)
    score_ref_cf = jnp.transpose(score_ref_cl, (0, 2, 1))  # (B, NC, N)

    # fused-transpose kernel straight from the channel-last producer layout
    box_cl, score_cl = split_and_scale_channel_last(x)
    jax.block_until_ready((box_cl, score_cl))
    assert box_cl.shape == (B, 4, N) and score_cl.shape == (B, NUM_CLASSES, N)
    assert jnp.allclose(box_cl, box_ref_cf, atol=1e-6)
    assert jnp.allclose(score_cl, score_ref_cf, atol=1e-6)

    # channel-first kernel (preferred when the producer can emit (B, C, N))
    box_cf, score_cf = split_and_scale_channel_first(jnp.transpose(x, (0, 2, 1)))
    jax.block_until_ready((box_cf, score_cf))
    assert jnp.allclose(box_cf, box_ref_cf, atol=1e-6)
    assert jnp.allclose(score_cf, score_ref_cf, atol=1e-6)

    # full module forward (TRT EfficientNMS stub outputs + raw kernel outputs)
    model = ONNX_TRT8_Pallas(max_obj=100, iou_thres=0.45, score_thres=0.25)
    (num_det, det_boxes, det_scores, det_classes), (b_raw, s_raw) = model(
        x, key=knms, return_raw=True)
    jax.block_until_ready((num_det, det_boxes, det_scores, det_classes,
                           b_raw, s_raw))
    assert num_det.shape == (B, 1) and num_det.dtype == jnp.int32
    assert det_boxes.shape == (B, 100, 4)
    assert det_scores.shape == (B, 100)
    assert det_classes.shape == (B, 100) and det_classes.dtype == jnp.int32
    assert jnp.allclose(b_raw, box_ref_cf, atol=1e-6)
    assert jnp.allclose(s_raw, score_ref_cf, atol=1e-6)

    print("KERNEL_OK")
</pallas_src>

<mosaic_0001>
module attributes {stable_mosaic.version = 11 : i64} {
  func.func @_split_scale_cl_kernel(%arg0: i32, %arg1: i32, %arg2: memref<1x384x13xf32, #tpu.memory_space<vmem>>, %arg3: memref<1x4x384xf32, #tpu.memory_space<vmem>>, %arg4: memref<1x8x384xf32, #tpu.memory_space<vmem>>) attributes {dimension_semantics = [#tpu.dimension_semantics<parallel>, #tpu.dimension_semantics<parallel>], iteration_bounds = array<i64: 2, 1>, scalar_prefetch = 0 : i64, scratch_operands = 0 : i64, tpu.core_type = #tpu.core_type<tc>, window_params = [{transform_indices = @transform_0, window_bounds = array<i64: 1, 384, 13>}, {transform_indices = @transform_1, window_bounds = array<i64: 1, 4, 384>}, {transform_indices = @transform_2, window_bounds = array<i64: 1, 8, 384>}]} {
    %c0 = arith.constant 0 : index
    %c0_0 = arith.constant 0 : index
    %c0_1 = arith.constant 0 : index
    %0 = vector.load %arg2[%c0, %c0_0, %c0_1] : memref<1x384x13xf32, #tpu.memory_space<vmem>>, vector<1x384x13xf32>
    %1 = tpu.transpose %0, [0, 2, 1] : vector<1x384x13xf32> -> vector<1x13x384xf32>
    %2 = vector.extract_strided_slice %1 {offsets = [0, 0, 0], sizes = [1, 4, 384], strides = [1, 1, 1]} : vector<1x13x384xf32> to vector<1x4x384xf32>
    %c0_2 = arith.constant 0 : index
    %c0_3 = arith.constant 0 : index
    %c0_4 = arith.constant 0 : index
    %3 = vector.load %arg3[%c0_2, %c0_3, %c0_4] : memref<1x4x384xf32, #tpu.memory_space<vmem>>, vector<1x4x384xf32>
    tpu.vector_store %arg3[%c0_2, %c0_3, %c0_4], %2 {strides = array<i32>} : memref<1x4x384xf32, #tpu.memory_space<vmem>>, vector<1x4x384xf32>,
    %4 = vector.extract_strided_slice %1 {offsets = [0, 5, 0], sizes = [1, 8, 384], strides = [1, 1, 1]} : vector<1x13x384xf32> to vector<1x8x384xf32>
    %5 = vector.extract_strided_slice %1 {offsets = [0, 4, 0], sizes = [1, 1, 384], strides = [1, 1, 1]} : vector<1x13x384xf32> to vector<1x1x384xf32>
    %6 = vector.broadcast %5 : vector<1x1x384xf32> to vector<1x8x384xf32>
    %7 = arith.mulf %4, %6 : vector<1x8x384xf32>
    %c0_5 = arith.constant 0 : index
    %c0_6 = arith.constant 0 : index
    %c0_7 = arith.constant 0 : index
    %8 = vector.load %arg4[%c0_5, %c0_6, %c0_7] : memref<1x8x384xf32, #tpu.memory_space<vmem>>, vector<1x8x384xf32>
    tpu.vector_store %arg4[%c0_5, %c0_6, %c0_7], %7 {strides = array<i32>} : memref<1x8x384xf32, #tpu.memory_space<vmem>>, vector<1x8x384xf32>,
    return
  }
  func.func @transform_0(%arg0: i32, %arg1: i32) -> (i32, i32, i32) {
    %c0_i32 = arith.constant 0 : i32
    %c0_i32_0 = arith.constant 0 : i32
    return %arg0, %arg1, %c0_i32 : i32, i32, i32
  }
  func.func @transform_1(%arg0: i32, %arg1: i32) -> (i32, i32, i32) {
    %c0_i32 = arith.constant 0 : i32
    %c0_i32_0 = arith.constant 0 : i32
    return %arg0, %c0_i32, %arg1 : i32, i32, i32
  }
  func.func @transform_2(%arg0: i32, %arg1: i32) -> (i32, i32, i32) {
    %c0_i32 = arith.constant 0 : i32
    %c0_i32_0 = arith.constant 0 : i32
    return %arg0, %c0_i32, %arg1 : i32, i32, i32
  }
}

</mosaic_0001>

<bundles_post_ra>
// kernel: tpu_custom_call.1
= control target key start
LH: loop header
LB: loop body
LE: loop exit
PB: predicated region body
PF: predicated region fallthrough
CT: control target
= control target key end

     0   :  { %8 = vsyncpa [#allocation3], 0  ;;  %s946_s0 = inlined_call_operand.vmem [shape: f32[2,300,13], index: 0, kind: input, shape index: {}]   ;;  %s947_s1 = inlined_call_operand.hbm [shape: f32[2,4,300], index: 1, kind: output, shape index: {0}]   ;;  %s948_s2 = inlined_call_operand.hbm [shape: f32[2,8,300], index: 2, kind: output, shape index: {1}]  }
   0x1   :  { %10 = vsyncpa [#allocation3 + $0x1], 0 }
   0x2   :  { %11 = vsyncpa [#allocation5], 0 }
   0x3   :  { %13 = vsyncpa [#allocation5 + $0x1], 0  ;;  %s740_s9 = smov 0   ;;  %s742_s10 = smov 0  }
   0x4   :  { %s744_s11 = smov 0   ;;  %s746_s12 = smov 0  }
   0x5   :  { %s748_s13 = smov 0   ;;  %s750_s14 = smov 0  }
   0x6 LB: > { %s536_s15 = sadd.s32 4294967295, %s721_s14   ;;  %s537_s16 = sadd.s32 4294967294, %s721_s14   ;;  %s721_s14 = sphi %s750_s14, %s19_s14   ;;  %s717_s13 = sphi %s748_s13, %s955_s13   ;;  %s713_s12 = sphi %s746_s12, %s954_s12   ;;  %s709_s11 = sphi %s744_s11, %s953_s11   ;;  %s705_s10 = sphi %s742_s10, %s952_s10   ;;  %s701_s9 = sphi %s740_s9, %s951_s9  }
   0x7   : > { %s31_s17 = sadd.s32 1, %s717_s13  ;;  %s68_s18 = sadd.s32 1, %s709_s11 }
   0x8   : > { %p33_p0 = scmp.ge.s32.totalorder %s31_s17, 2  ;;  %p78_p1 = scmp.ne.s32.totalorder %s709_s11, %s705_s10 }
   0x9   : > { %p79_p2 = scmp.eq.s32.totalorder %s536_s15, 1  ;;  %p84_p3 = scmp.ne.s32.totalorder %s705_s10, %s701_s9 }
   0xa   : > { %s957_s17 = smov (%p33_p0, %s31_s17), 0  ;;  %p85_p5 = scmp.eq.s32.totalorder %s537_s16, 1 }
   0xb   : > { %p780_p4 = por %p79_p2, %p78_p1  ;;  %s63_s20 = ssub.s32 %s717_s13, %s957_s17 }
   0xc   : > { %p540_p6 = scmp.ge.s32.totalorder %s721_s14, 1  ;;  %p66_p7 = scmp.eq.s32.totalorder %s63_s20, 0 }
   0xd   : > { %p787_p8 = por %p85_p5, %p84_p3  ;;  %p148_p9 = scmp.lt.s32.totalorder %s721_s14, 3 }
   0xe   : > { %s793_s22 = scalar_select %p66_p7, %s709_s11, %s68_s18  }
   0xf   : > { %p149_p10 = pnand %p540_p6, %p148_p9 }
  0x10   : > { %p184_p11 = scmp.lt.s32.totalorder (!%p149_p10), %s713_s12, 1  ;;  %v347_v47 = vlaneseq (!%p149_p10)  ;;  %s851_s28 = sand.u32 (!%p149_p10), 1, %s705_s10   ;;  %vm371_vm0 = vcmask (!%p149_p10), 1042432  }
  0x11   : > { %152 = sbr.rel (%p149_p10) target bundleno = 262 (0x106), region = 24  ;;  %s388_s16 = scalar_lea.sflag (!%p149_p10), [#allocation3], %s851_s28 }
  0x12   : > { %v348_v49 = vshrl.u32 (!%p149_p10), %v347_v47, 7  ;;  %s546_s29 = smul.u32 (!%p149_p10), 12, %s851_s28  ;;  %s723_s20 = smov (!%p149_p10), [#allocation2]  }
  0x13   : > { %s547_s30 = smul.u32 (!%p149_p10), 24, %s851_s28 }
  0x14   : > { %v349_v50 = vsub.s32 (!%p149_p10), 4, %v348_v49  ;;  %s173_s3 = scalar_lea.vmem (!%p149_p10), [#allocation2], %s546_s29  ;;  %s549_s5 = smul.u32 (!%p149_p10), 192, %s713_s12 }
  0x15   : > { %s856_s4 = scalar_lea.vmem (!%p149_p10), [#allocation4], %s547_s30  ;;  %s409_s6 = sshll.u32 (!%p149_p10), %s173_s3, 4  ;;  %s867_s6 = int_to_ptr.vmem [resolvable:$true] %s409_s6 }
  0x16   : > { %s865_s15 = scalar_lea.hbm (!%p149_p10), %s947_s1, %s549_s5  ;;  %s611_s18 = scalar_lea.vmem (!%p149_p10), %s867_s6, 192 }
  0x17   : > { %p612_p12 = scmp.ne.s32.totalorder (!%p149_p10), %s867_s6, %s611_s18 }
  0x18   : > { %s185_s23 = scalar_select %p184_p11, %s713_s12, 1 }
  0x19   : > { %p613_p13 = pnand %p612_p12, %p780_p4 }
  0x1a   : > { %s548_s24 = smul.u32 304, %s185_s23  ;;  %s615_s23 = sshll.u32 %s723_s20, 4  ;;  %s616_s23 = int_to_ptr.vmem [resolvable:$false] %s615_s23 }
  0x1b   : > { %p614_p0 = pneg %p613_p13  ;;  %p618_p1 = scmp.lt.s32.totalorder %s867_s6, %s616_s23 }
  0x1c   : > { %s800_s27 = scalar_lea.vmem %s946_s0, %s548_s24  ;;  %s617_s24 = scalar_lea.vmem %s616_s23, 384 }
  0x1d   : > { %v197_v0 = vld [vmem:[%s800_s27] sm:$0xff]  ;;  %v198_v1 = vld [vmem:[%s800_s27 + $0x8] sm:$0xff]  ;;  %v199_v3 = vld [vmem:[%s800_s27 + $0x10] sm:$0xff]  ;;  %p619_p2 = scmp.lt.s32.totalorder %s617_s24, %s611_s18 }
  0x1e   : > { %245 = vxpose.xlu0.b32.start [1/16] (narrow) %v197_v0, 16  ;;  %v213_v2 = vld [vmem:[%s800_s27 + $0x80] sm:$0xff]  ;;  %v214_v4 = vld [vmem:[%s800_s27 + $0x88] sm:$0xff]  ;;  %v200_v5 = vld [vmem:[%s800_s27 + $0x18] sm:$0xff] }
  0x1f   : > { %277 = vxpose.xlu1.b32.start [1/16] (narrow) %v213_v2, 16  ;;  %v215_v6 = vld [vmem:[%s800_s27 + $0x90] sm:$0xff]  ;;  %v201_v7 = vld [vmem:[%s800_s27 + $0x20] sm:$0xff]  ;;  %v216_v8 = vld [vmem:[%s800_s27 + $0x98] sm:$0xff]  ;;  %p620_p3 = por %p619_p2, %p618_p1 }
  0x20   : > { %v202_v9 = vld [vmem:[%s800_s27 + $0x28] sm:$0xff]  ;;  %v217_v10 = vld [vmem:[%s800_s27 + $0xa0] sm:$0xff]  ;;  %v203_v11 = vld [vmem:[%s800_s27 + $0x30] sm:$0xff] }
  0x21   : > { %v218_v12 = vld [vmem:[%s800_s27 + $0xa8] sm:$0xff]  ;;  %v204_v13 = vld [vmem:[%s800_s27 + $0x38] sm:$0xff]  ;;  %v219_v14 = vld [vmem:[%s800_s27 + $0xb0] sm:$0xff]  ;;  %p621_p5 = pnand %p620_p3, %p614_p0 }
  0x22   : > { %246 = vxpose.xlu0.b32.cont [2/16] (narrow) %v198_v1, 16  ;;  %v205_v15 = vld [vmem:[%s800_s27 + $0x40] sm:$0xff]  ;;  %v220_v16 = vld [vmem:[%s800_s27 + $0xb8] sm:$0xff]  ;;  %v206_v17 = vld [vmem:[%s800_s27 + $0x48] sm:$0xff] }
  0x23   : > { %278 = vxpose.xlu1.b32.cont [2/16] (narrow) %v214_v4, 16  ;;  %v221_v18 = vld [vmem:[%s800_s27 + $0xc0] sm:$0xff]  ;;  %v207_v19 = vld [vmem:[%s800_s27 + $0x50] sm:$0xff]  ;;  %v222_v20 = vld [vmem:[%s800_s27 + $0xc8] sm:$0xff] }
  0x24   : > { %v208_v21 = vld [vmem:[%s800_s27 + $0x58] sm:$0xff]  ;;  %v223_v22 = vld [vmem:[%s800_s27 + $0xd0] sm:$0xff]  ;;  %v209_v23 = vld [vmem:[%s800_s27 + $0x60] sm:$0xff] }
  0x25   : > { %v224_v24 = vld [vmem:[%s800_s27 + $0xd8] sm:$0xff]  ;;  %v210_v25 = vld [vmem:[%s800_s27 + $0x68] sm:$0xff]  ;;  %v225_v26 = vld [vmem:[%s800_s27 + $0xe0] sm:$0xff] }
  0x26   : > { %247 = vxpose.xlu0.b32.cont [3/16] (narrow) %v199_v3, 16  ;;  %v211_v27 = vld [vmem:[%s800_s27 + $0x70] sm:$0xff]  ;;  %v226_v28 = vld [vmem:[%s800_s27 + $0xe8] sm:$0xff]  ;;  %v212_v29 = vld [vmem:[%s800_s27 + $0x78] sm:$0xff] }
  0x27   : > { %279 = vxpose.xlu1.b32.cont [3/16] (narrow) %v215_v6, 16  ;;  %v227_v30 = vld [vmem:[%s800_s27 + $0xf0] sm:$0xff]  ;;  %v229_v31 = vld [vmem:[%s800_s27 + $0x100] sm:$0xff]  ;;  %v228_v32 = vld [vmem:[%s800_s27 + $0xf8] sm:$0xff] }
  0x28   : > { %v230_v33 = vld [vmem:[%s800_s27 + $0x108] sm:$0xff]  ;;  %v231_v34 = vld [vmem:[%s800_s27 + $0x110] sm:$0xff]  ;;  %v232_v35 = vld [vmem:[%s800_s27 + $0x118] sm:$0xff] }
  0x29   : > { %v233_v36 = vld [vmem:[%s800_s27 + $0x120] sm:$0xff]  ;;  %v234_v37 = vld [vmem:[%s800_s27 + $0x128] sm:$0xff]  ;;  %v235_v38 = vld [vmem:[%s800_s27 + $0x130] sm:$0xff] }
  0x2a   : > { %248 = vxpose.xlu0.b32.cont [4/16] (narrow) %v200_v5, 16  ;;  %v236_v39 = vld [vmem:[%s800_s27 + $0x138] sm:$0xff]  ;;  %v237_v40 = vld [vmem:[%s800_s27 + $0x140] sm:$0xff]  ;;  %v238_v41 = vld [vmem:[%s800_s27 + $0x148] sm:$0xff] }
  0x2b   : > { %280 = vxpose.xlu1.b32.cont [4/16] (narrow) %v216_v8, 16  ;;  %v239_v42 = vld [vmem:[%s800_s27 + $0x150] sm:$0xff]  ;;  %v240_v43 = vld [vmem:[%s800_s27 + $0x158] sm:$0xff]  ;;  %v241_v44 = vld [vmem:[%s800_s27 + $0x160] sm:$0xff] }
  0x2c   : > { %v242_v45 = vld [vmem:[%s800_s27 + $0x168] sm:$0xff]  ;;  %v243_v46 = vld [vmem:[%s800_s27 + $0x170] sm:$0xff]  ;;  %v244_v48 = vld [vmem:[%s800_s27 + $0x178] sm:$0xff] }
  0x2e   : > { %249 = vxpose.xlu0.b32.cont [5/16] (narrow) %v201_v7, 16 }
  0x2f   : > { %281 = vxpose.xlu1.b32.cont [5/16] (narrow) %v217_v10, 16 }
  0x32   : > { %250 = vxpose.xlu0.b32.cont [6/16] (narrow) %v202_v9, 16 }
  0x33   : > { %282 = vxpose.xlu1.b32.cont [6/16] (narrow) %v218_v12, 16 }
  0x36   : > { %251 = vxpose.xlu0.b32.cont [7/16] (narrow) %v203_v11, 16 }
  0x37   : > { %283 = vxpose.xlu1.b32.cont [7/16] (narrow) %v219_v14, 16 }
  0x3a   : > { %252 = vxpose.xlu0.b32.cont [8/16] (narrow) %v204_v13, 16 }
  0x3b   : > { %284 = vxpose.xlu1.b32.cont [8/16] (narrow) %v220_v16, 16 }
  0x3e   : > { %253 = vxpose.xlu0.b32.cont [9/16] (narrow) %v205_v15, 16 }
  0x3f   : > { %285 = vxpose.xlu1.b32.cont [9/16] (narrow) %v221_v18, 16 }
  0x42   : > { %254 = vxpose.xlu0.b32.cont [10/16] (narrow) %v206_v17, 16 }
  0x43   : > { %286 = vxpose.xlu1.b32.cont [10/16] (narrow) %v222_v20, 16 }
  0x46   : > { %255 = vxpose.xlu0.b32.cont [11/16] (narrow) %v207_v19, 16 }
  0x47   : > { %287 = vxpose.xlu1.b32.cont [11/16] (narrow) %v223_v22, 16 }
  0x4a   : > { %256 = vxpose.xlu0.b32.cont [12/16] (narrow) %v208_v21, 16 }
  0x4b   : > { %288 = vxpose.xlu1.b32.cont [12/16] (narrow) %v224_v24, 16 }
  0x4e   : > { %257 = vxpose.xlu0.b32.cont [13/16] (narrow) %v209_v23, 16 }
  0x4f   : > { %289 = vxpose.xlu1.b32.cont [13/16] (narrow) %v225_v26, 16 }
  0x52   : > { %258 = vxpose.xlu0.b32.cont [14/16] (narrow) %v210_v25, 16 }
  0x53   : > { %290 = vxpose.xlu1.b32.cont [14/16] (narrow) %v226_v28, 16 }
  0x56   : > { %259 = vxpose.xlu0.b32.cont [15/16] (narrow) %v211_v27, 16 }
  0x57   : > { %291 = vxpose.xlu1.b32.cont [15/16] (narrow) %v227_v30, 16 }
  0x5a   : > { %260 = vxpose.xlu0.b32.end [16/16] (narrow) %v212_v29, 16 }
  0x5b   : > { %292 = vxpose.xlu1.b32.end [16/16] (narrow) %v228_v32, 16 }
  0x5e   : > { %309 = vxpose.xlu0.b32.start [1/16] (narrow) %v229_v31, 16 }
  0x62   : > { %310 = vxpose.xlu0.b32.cont [2/16] (narrow) %v230_v33, 16 }
  0x66   : > { %311 = vxpose.xlu0.b32.cont [3/16] (narrow) %v231_v34, 16 }
  0x6a   : > { %312 = vxpose.xlu0.b32.cont [4/16] (narrow) %v232_v35, 16 }
  0x6e   : > { %313 = vxpose.xlu0.b32.cont [5/16] (narrow) %v233_v36, 16 }
  0x72   : > { %314 = vxpose.xlu0.b32.cont [6/16] (narrow) %v234_v37, 16 }
  0x76   : > { %315 = vxpose.xlu0.b32.cont [7/16] (narrow) %v235_v38, 16 }
  0x7a   : > { %316 = vxpose.xlu0.b32.cont [8/16] (narrow) %v236_v39, 16 }
  0x7e   : > { %317 = vxpose.xlu0.b32.cont [9/16] (narrow) %v237_v40, 16 }
  0x82   : > { %318 = vxpose.xlu0.b32.cont [10/16] (narrow) %v238_v41, 16 }
  0x86   : > { %319 = vxpose.xlu0.b32.cont [11/16] (narrow) %v239_v42, 16 }
  0x8a   : > { %320 = vxpose.xlu0.b32.cont [12/16] (narrow) %v240_v43, 16 }
  0x8e   : > { %321 = vxpose.xlu0.b32.cont [13/16] (narrow) %v241_v44, 16 }
  0x92   : > { %322 = vxpose.xlu0.b32.cont [14/16] (narrow) %v242_v45, 16 }
  0x96   : > { %323 = vxpose.xlu0.b32.cont [15/16] (narrow) %v243_v46, 16 }
  0x9a   : > { %324 = vxpose.xlu0.b32.end [16/16] (narrow) %v244_v48, 16 }
  0x9e   : > { %v261_v51 = vpop.trf.xlu0 }
  0x9f   : > { %v350_v52 = vrot.slane %v261_v51, %v349_v50  ;;  %v293_v54 = vpop.trf.xlu1 }
  0xa0   : > { %v343_v56 = vcombine.low %v261_v51, %v293_v54  ;;  %v354_v59 = vrot.slane %v293_v54, %v349_v50 }
  0xa1   : > { %v359_v53 = vmul.f32 %v350_v52, %v261_v51 }
  0xa2   : > { %v262_v55 = vpop.trf.xlu0  ;;  %345 = vst [vmem:[%s173_s3] sm:$0xff] %v343_v56  ;;  %v360_v61 = vmul.f32 %v354_v59, %v293_v54 }
  0xa3   : > { %v372_v57 = vrot.slane %v359_v53, 5  ;;  %v362_v58 = vmul.f32 %v350_v52, %v262_v55  ;;  %v294_v62 = vpop.trf.xlu1 }
  0xa4   : > { %v375_v0 = vrot.slane %v360_v61, 5  ;;  %v363_v1 = vmul.f32 %v354_v59, %v294_v62 }
  0xa5   : > { %v373_v60 = vrot.slane %v362_v58, 5 }
  0xa6   : > { %v376_v2 = vrot.slane %v363_v1, 5 }
  0xa7   : > { %v374_v63 = vsel %vm371_vm0, %v372_v57, %v373_v60 }
  0xa8   : > { %384 = vst [vmem:[%s856_s4] sm:$0xff] %v374_v63  ;;  %v377_v3 = vsel %vm371_vm0, %v375_v0, %v376_v2 }
  0xa9   : > { %385 = vst [vmem:[%s856_s4 + $0x8] sm:$0xff] %v377_v3 }
  0xde   : > { %v325_v4 = vpop.trf.xlu0 }
  0xdf   : > { %346 = vst [vmem:[%s173_s3 + $0x8] sm:$0xf] %v325_v4  ;;  %v358_v5 = vrot.slane %v325_v4, %v349_v50 }
  0xe0   : > { %624 = shalt.err (!%p621_p5)
}
  0xe1   : > { %s625_s25 = scalar_lea.hbm %s865_s15, 192  ;;  %s629_s29 = scalar_lea.hbm %s947_s1, 384 }
  0xe2   : > { %p626_p6 = scmp.ne.s32.totalorder %s865_s15, %s625_s25  ;;  %p630_p10 = scmp.lt.u32.totalorder %s865_s15, %s947_s1 }
  0xe3   : > { %p631_p11 = scmp.lt.u32.totalorder %s629_s29, %s625_s25  ;;  %p633_p13 = scmp.lt.u32.totalorder %s625_s25, %s865_s15 }
  0xe4   : > { %p627_p7 = pnand %p626_p6, %p780_p4 }
  0xe5   : > { %p632_p12 = por %p631_p11, %p630_p10 }
  0xe6   : > { %p628_p9 = pneg %p627_p7 }
  0xe7   : > { %p634_p0 = por %p633_p13, %p632_p12 }
  0xe9   : > { %p635_p1 = pnand %p634_p0, %p628_p9 }
  0xeb   : > { %638 = shalt.err (!%p635_p1)
}
  0xec   : > { %551 = dma.vmem_to_hbm [thread:$0]  (%p780_p4), %s867_s6, 192, %s865_s15, %s388_s16   ;;  %v361_v6 = vmul.f32 %v358_v5, %v325_v4  ;;  %v326_v7 = vpop.trf.xlu0 }
  0xed   : > { %s550_s5 = smul.u32 384, %s713_s12  ;;  %v364_v8 = vmul.f32 %v358_v5, %v326_v7  ;;  %s425_s7 = sshll.u32 %s856_s4, 4  ;;  %s898_s7 = int_to_ptr.vmem [resolvable:$true] %s425_s7 }
  0xee   : > { %v378_v9 = vrot.slane %v361_v6, 5  ;;  %s393_s6 = scalar_lea.sflag [#allocation5], %s851_s28  ;;  %s639_s15 = scalar_lea.vmem %s898_s7, 384 }
  0xef   : > { %v379_v10 = vrot.slane %v364_v8, 5  ;;  %s896_s20 = scalar_lea.hbm %s948_s2, %s550_s5  ;;  %p640_p2 = scmp.ne.s32.totalorder %s898_s7, %s639_s15 }
  0xf0   : > { %s724_s12 = smov [#allocation4]  }
  0xf1   : > { %v380_v11 = vsel %vm371_vm0, %v378_v9, %v379_v10  ;;  %p641_p3 = pnand %p640_p2, %p780_p4  ;;  %s643_s16 = sshll.u32 %s724_s12, 4  ;;  %s644_s16 = int_to_ptr.vmem [resolvable:$false] %s643_s16 }
  0xf2   : > { %386 = vst [vmem:[%s856_s4 + $0x10] sm:$0xff] %v380_v11  ;;  %s645_s23 = scalar_lea.vmem %s644_s16, 768  ;;  %p646_p6 = scmp.lt.s32.totalorder %s898_s7, %s644_s16 }
  0xf3   : > { %p642_p5 = pneg %p641_p3  ;;  %p647_p7 = scmp.lt.s32.totalorder %s645_s23, %s639_s15 }
  0xf5   : > { %p648_p9 = por %p647_p7, %p646_p6 }
  0xf7   : > { %p649_p10 = pnand %p648_p9, %p642_p5 }
  0xf9   : > { %652 = shalt.err (!%p649_p10)
}
  0xfa   : > { %s653_s28 = scalar_lea.hbm %s896_s20, 384  ;;  %s657_s25 = scalar_lea.hbm %s948_s2, 768 }
  0xfb   : > { %p654_p11 = scmp.ne.s32.totalorder %s896_s20, %s653_s28  ;;  %p658_p0 = scmp.lt.u32.totalorder %s896_s20, %s948_s2 }
  0xfc   : > { %p659_p1 = scmp.lt.u32.totalorder %s657_s25, %s653_s28  ;;  %p661_p3 = scmp.lt.u32.totalorder %s653_s28, %s896_s20 }
  0xfd   : > { %p655_p12 = pnand %p654_p11, %p780_p4 }
  0xfe   : > { %p660_p2 = por %p659_p1, %p658_p0 }
  0xff   : > { %p656_p13 = pneg %p655_p12 }
 0x100   : > { %p662_p5 = por %p661_p3, %p660_p2 }
 0x102   : > { %p663_p6 = pnand %p662_p5, %p656_p13 }
 0x104   : > { %666 = shalt.err (!%p663_p6)
}
 0x105   : > { %552 = dma.vmem_to_hbm [thread:$0]  (%p780_p4), %s898_s7, 384, %s896_s20, %s393_s6  }
 0x106 PF: > { %p562_p7 = scmp.ge.s32.totalorder %s721_s14, 2  ;;  %s437_s29 = sand.u32 1, %s701_s9  }
 0x107   : > { %s438_s30 = scalar_lea.sflag [#allocation3], %s437_s29 }
 0x108   : > { %p556_p9 = pnand %p562_p7, %p787_p8 }
 0x10a   : > { %692 = dma.done.wait (!%p556_p9), %s438_s30, 192  }
 0x10b   : > { %694 = vsyncadd (!%p556_p9), %s438_s30, 4294967104  ;;  %s447_s3 = scalar_lea.sflag [#allocation5], %s437_s29 }
 0x10c   : > { %696 = dma.done.wait (!%p556_p9), %s447_s3, 384  }
 0x10d   : > { %698 = vsyncadd (!%p556_p9), %s447_s3, 4294966912  ;;  %s19_s14 = sadd.s32 1, %s721_s14   ;;  %s951_s9 = smov %s705_s10 }
 0x10e   : > { %p16_p10 = scmp.ge.s32.totalorder %s19_s14, 4   ;;  %s952_s10 = smov %s709_s11 }
 0x10f   : > { %s953_s11 = smov %s793_s22  ;;  %s954_s12 = smov %s717_s13 }
 0x110   : > { %s955_s13 = smov %s957_s17  ;;  %18 = sbr.rel (!%p16_p10) target bundleno = 6 (0x6), region = 76 }
 0x117   :  { %452 = vsyncpa [#allocation3], 1 }
 0x118   :  { %454 = vsyncpa [#allocation3 + $0x1], 1 }
 0x119   :  { %455 = vsyncpa [#allocation5], 1 }
 0x11a   :  { %457 = vsyncpa [#allocation5 + $0x1], 1 }

</bundles_post_ra>
